<compile_context>
chip_gen: v6e
topology: v6e:2x2x1
jax: 0.10.0
libtpu: 0.0.40
codegen_flags: <defaults>
</compile_context>

<pallas_src>
import functools
import math

import jax
import jax.numpy as jnp
import numpy as np
from jax.experimental import pallas as pl
from jax.experimental.pallas import tpu as pltpu

POS_DIM = 40          # pos_dim in the PyTorch module (must be even)
MAX_LEN = 2000        # max_len in the PyTorch module (only L <= MAX_LEN allowed)


def _build_pe_table(length):
    """(length, POS_DIM) sinusoidal table, float32, batch-invariant."""
    position = np.arange(0, length, dtype=np.float32)[:, None]
    div_term = np.exp(np.arange(0, POS_DIM, 2, dtype=np.float32)
                      * -(math.log(10000.0) / POS_DIM))
    pe = np.zeros((length, POS_DIM), dtype=np.float32)
    pe[:, 0::2] = np.sin(position * div_term)
    pe[:, 1::2] = np.cos(position * div_term)
    return pe


# Computed exactly once at import; per-call work is just a slice + cached H2D.
_PE_FULL_NP = _build_pe_table(MAX_LEN)
_PE_DEVICE_CACHE = {}


def _pe_device(L, l_pad, dtype):
    key = (int(L), int(l_pad), jnp.dtype(dtype).name)
    if key not in _PE_DEVICE_CACHE:
        pe = _PE_FULL_NP[:L]
        if l_pad > L:
            pe = np.concatenate(
                [pe, np.zeros((l_pad - L, POS_DIM), np.float32)], axis=0)
        _PE_DEVICE_CACHE[key] = jnp.asarray(pe, dtype=dtype)
    return _PE_DEVICE_CACHE[key]


def _vmem_capacity_bytes():
    try:
        return int(pltpu.get_tpu_info().vmem_capacity_bytes)
    except Exception:
        return 64 << 20   # conservative fallback (v7x per-TC capacity)


def _sublane_granularity(itemsize):
    # Sub-32-bit dtypes pack along sublanes: keep TL a multiple of the packing.
    return {4: 8, 2: 16, 1: 32}.get(int(itemsize), 8)


def _choose_tiles(B, L, D, itemsize, budget):
    """Pick (TL, TB) so double-buffered x+out blocks fit `budget` bytes."""
    g = _sublane_granularity(itemsize)
    # Per sequence row, per batch row: x row (D) + out row (D + POS_DIM),
    # each double-buffered by the pipeline.
    per_row = 2 * (2 * D + POS_DIM) * itemsize
    tl = max(g, budget // max(per_row, 1))
    if tl >= L:
        tl = L                      # full extent is always a legal block shape
    else:
        tl = max(g, (tl // g) * g)

    per_batch = per_row * tl
    tb = max(1, min(B, budget // max(per_batch, 1)))

    # Megacore (v7x has 2 TCs): avoid a degenerate (1, 1) grid.
    n_l = pl.cdiv(L, tl)
    if n_l == 1 and tb >= B:
        if B > 1:
            tb = max(1, (B + 1) // 2)
        elif L >= 2 * g:
            tl = max(g, ((L // 2) // g) * g)
    return tl, tb


def _pos_enc_kernel(x_ref, pe_ref, o_ref, *, tl, d):
    # x_ref: (TB, TL, D); pe_ref: (L_pad, POS_DIM) full, VMEM-resident;
    # o_ref: (TB, TL, D + POS_DIM)
    tb = x_ref.shape[0]

    if pe_ref.shape[0] == tl:
        pe = pe_ref[...]                                   # single L-tile case
    else:
        start = pl.multiple_of(pl.program_id(1) * tl, tl)  # aligned dynamic slice
        pe = pe_ref[pl.ds(start, tl), :]
    pe = pe.astype(o_ref.dtype)
    pe_b = jnp.broadcast_to(pe[None, :, :], (tb, tl, POS_DIM))

    if d % 128 == 0:
        # x part is a pure aligned copy; only the 40-lane tail is narrow.
        o_ref[:, :, :d] = x_ref[...]
        o_ref[:, :, d:] = pe_b
    else:
        # Build the row in-register, one full-block lane-dense store.
        o_ref[...] = jnp.concatenate([x_ref[...], pe_b], axis=-1)


def position_encoding(x):
    """x: (B, L, D) -> (B, L, D + POS_DIM); out[..., :D] = x, out[..., D:] = pe[l]."""
    B, L, D = x.shape
    assert L <= MAX_LEN, "sequence length exceeds max_len"
    itemsize = jnp.dtype(x.dtype).itemsize

    cap = _vmem_capacity_bytes()
    # ~48 MiB of blocks on v7x (64 MiB VMEM), 64 MiB on v5e/v6e (128 MiB VMEM).
    budget = min(int(cap * 0.75), 64 << 20)

    tl, tb = _choose_tiles(B, L, D, itemsize, budget)
    n_l = pl.cdiv(L, tl)
    n_b = pl.cdiv(B, tb)
    l_pad = n_l * tl

    pe = _pe_device(L, l_pad, x.dtype)
    out_shape = jax.ShapeDtypeStruct((B, L, D + POS_DIM), x.dtype)

    # Memory-roofline hint: read x + pe (once), write out.
    bytes_accessed = (B * L * D + B * L * (D + POS_DIM)) * itemsize \
        + l_pad * POS_DIM * itemsize

    # Actual VMEM need: double-buffered x+out blocks + resident (dbl-buf) pe.
    block_bytes = 2 * tb * tl * (2 * D + POS_DIM) * itemsize
    pe_bytes = 2 * l_pad * POS_DIM * itemsize
    needed = block_bytes + pe_bytes
    vmem_limit = int(min(max(needed + (8 << 20), 32 << 20), int(cap * 0.9)))
    vmem_limit = max(vmem_limit, needed + (4 << 20))

    kernel = functools.partial(_pos_enc_kernel, tl=tl, d=D)

    return pl.pallas_call(
        kernel,
        out_shape=out_shape,
        grid_spec=pltpu.PrefetchScalarGridSpec(
            num_scalar_prefetch=0,
            grid=(n_b, n_l),   # batch-outermost; pe is resident so order is free
            in_specs=[
                pl.BlockSpec((tb, tl, D), lambda b, l: (b, l, 0)),
                pl.BlockSpec((l_pad, POS_DIM), lambda b, l: (0, 0)),  # resident
            ],
            out_specs=pl.BlockSpec((tb, tl, D + POS_DIM), lambda b, l: (b, l, 0)),
        ),
        compiler_params=pltpu.CompilerParams(
            dimension_semantics=("parallel", "parallel"),
            vmem_limit_bytes=vmem_limit),
        cost_estimate=pl.CostEstimate(
            flops=0, transcendentals=0, bytes_accessed=bytes_accessed),
    )(x, pe)


def _reference_numpy(x):
    """Pure-numpy replica of the PyTorch module for validation."""
    B, L, D = x.shape
    pe = _build_pe_table(MAX_LEN)
    pos_enc = np.broadcast_to(pe[None, :L], (B, L, POS_DIM))
    return np.concatenate([np.asarray(x, dtype=np.float32), pos_enc], axis=2)


if __name__ == "__main__":
    key = jax.random.PRNGKey(0)
    B, L, D = 2, 8, 32
    x = jax.random.normal(key, (B, L, D), dtype=jnp.float32)

    out = position_encoding(x)
    out = jax.block_until_ready(out)

    ref = _reference_numpy(np.asarray(x))
    assert out.shape == (B, L, D + POS_DIM), out.shape
    np.testing.assert_allclose(np.asarray(out), ref, rtol=1e-5, atol=1e-5)

    print("KERNEL_OK")
</pallas_src>

<mosaic_0001>
module attributes {stable_mosaic.version = 11 : i64} {
  func.func @_pos_enc_kernel(%arg0: i32, %arg1: i32, %arg2: memref<1x8x32xf32, #tpu.memory_space<vmem>>, %arg3: memref<8x40xf32, #tpu.memory_space<vmem>>, %arg4: memref<1x8x72xf32, #tpu.memory_space<vmem>>) attributes {dimension_semantics = [#tpu.dimension_semantics<parallel>, #tpu.dimension_semantics<parallel>], iteration_bounds = array<i64: 2, 1>, scalar_prefetch = 0 : i64, scratch_operands = 0 : i64, tpu.core_type = #tpu.core_type<tc>, window_params = [{transform_indices = @transform_0, window_bounds = array<i64: 1, 8, 32>}, {pipeline_mode = #tpu.pipeline_mode<synchronous>, transform_indices = @transform_1, window_bounds = array<i64: 8, 40>}, {transform_indices = @transform_2, window_bounds = array<i64: 1, 8, 72>}]} {
    %c0 = arith.constant 0 : index
    %c0_0 = arith.constant 0 : index
    %0 = vector.load %arg3[%c0, %c0_0] : memref<8x40xf32, #tpu.memory_space<vmem>>, vector<8x40xf32>
    %1 = vector.shape_cast %0 : vector<8x40xf32> to vector<1x8x40xf32>
    %c0_1 = arith.constant 0 : index
    %c0_2 = arith.constant 0 : index
    %c0_3 = arith.constant 0 : index
    %2 = vector.load %arg2[%c0_1, %c0_2, %c0_3] : memref<1x8x32xf32, #tpu.memory_space<vmem>>, vector<1x8x32xf32>
    %3 = tpu.concatenate %2, %1 in 2 : vector<1x8x32xf32>, vector<1x8x40xf32> -> vector<1x8x72xf32>
    %c0_4 = arith.constant 0 : index
    %c0_5 = arith.constant 0 : index
    %c0_6 = arith.constant 0 : index
    %4 = vector.load %arg4[%c0_4, %c0_5, %c0_6] : memref<1x8x72xf32, #tpu.memory_space<vmem>>, vector<1x8x72xf32>
    tpu.vector_store %arg4[%c0_4, %c0_5, %c0_6], %3 {strides = array<i32>} : memref<1x8x72xf32, #tpu.memory_space<vmem>>, vector<1x8x72xf32>,
    return
  }
  func.func @transform_0(%arg0: i32, %arg1: i32) -> (i32, i32, i32) {
    %c0_i32 = arith.constant 0 : i32
    %c0_i32_0 = arith.constant 0 : i32
    return %arg0, %arg1, %c0_i32 : i32, i32, i32
  }
  func.func @transform_1(%arg0: i32, %arg1: i32) -> (i32, i32) {
    %c0_i32 = arith.constant 0 : i32
    %c0_i32_0 = arith.constant 0 : i32
    %c0_i32_1 = arith.constant 0 : i32
    return %c0_i32, %c0_i32_0 : i32, i32
  }
  func.func @transform_2(%arg0: i32, %arg1: i32) -> (i32, i32, i32) {
    %c0_i32 = arith.constant 0 : i32
    %c0_i32_0 = arith.constant 0 : i32
    return %arg0, %arg1, %c0_i32 : i32, i32, i32
  }
}

</mosaic_0001>

<bundles_post_ra>
// kernel: tpu_custom_call.1
= control target key start
LH: loop header
LB: loop body
LE: loop exit
PB: predicated region body
PF: predicated region fallthrough
CT: control target
= control target key end

     0   :  { %7 = vsyncpa [#allocation3], 0  ;;  %s719_s0 = inlined_call_operand.hbm [shape: f32[2,8,32], index: 0, kind: input, shape index: {}]   ;;  %s720_s1 = inlined_call_operand.hbm [shape: f32[8,40], index: 1, kind: input, shape index: {}]   ;;  %s721_s2 = inlined_call_operand.hbm [shape: f32[2,8,72], index: 2, kind: output, shape index: {}]  }
   0x1   :  { %9 = vsyncpa [#allocation3 + $0x1], 0 }
   0x2   :  { %10 = vsyncpa [#allocation6], 0 }
   0x3   :  { %11 = vsyncpa [#allocation4], 0 }
   0x4   :  { %13 = vsyncpa [#allocation4 + $0x1], 0  ;;  %s552_s9 = smov 0   ;;  %s554_s10 = smov 0  }
   0x5   :  { %s556_s11 = smov 0   ;;  %s558_s12 = smov 0  }
   0x6   :  { %s560_s13 = smov 0   ;;  %s562_s14 = smov 0  }
   0x7 LB: > { %s304_s15 = sadd.s32 4294967295, %s531_s14   ;;  %s305_s16 = sadd.s32 4294967294, %s531_s14   ;;  %s531_s14 = sphi %s562_s14, %s19_s14   ;;  %s527_s13 = sphi %s560_s13, %s738_s13   ;;  %s523_s12 = sphi %s558_s12, %s737_s12   ;;  %s519_s11 = sphi %s556_s11, %s736_s11   ;;  %s515_s10 = sphi %s554_s10, %s735_s10   ;;  %s511_s9 = sphi %s552_s9, %s734_s9  }
   0x8   : > { %p53_p0 = scmp.ne.s32.totalorder %s515_s10, %s511_s9  ;;  %p586_p1 = scmp.eq.s32.totalorder %s304_s15, 0 }
   0x9   : > { %p590_p2 = scmp.eq.s32.totalorder %s304_s15, 1  ;;  %p106_p3 = scmp.eq.s32.totalorder %s305_s16, 1 }
   0xa   : > { %p596_p4 = por %p586_p1, %p53_p0  ;;  %p306_p5 = scmp.ge.s32.totalorder %s531_s14, 1 }
   0xb   : > { %p601_p6 = por %p106_p3, %p53_p0  ;;  %p113_p7 = scmp.lt.s32.totalorder %s531_s14, 3 }
   0xc   : > { %s725_s19 = scalar_select %p596_p4, 1, 0 }
   0xd   : > { %s726_s20 = scalar_select %p601_p6, 1, 0 }
   0xe   : > { %p606_p8 = pnand %p306_p5, %p113_p7  ;;  %s533_s22 = smov [#allocation5]  }
   0xf   : > { %s126_s23 = sshll.u32 %s533_s22, 4  ;;  %s31_s25 = sadd.s32 1, %s527_s13  ;;  %s127_s23 = int_to_ptr.vmem [resolvable:$true] %s126_s23 }
  0x10   : > { %p327_p10 = pneg %p606_p8  ;;  %s40_s26 = sadd.s32 1, %s519_s11 }
  0x11   : > { %p33_p12 = scmp.ge.s32.totalorder %s31_s25, 2  ;;  %s404_s27 = scalar_lea.vmem %s127_s23, 128 }
  0x12   : > { %p615_p11 = pnand %p327_p10, %p586_p1  ;;  %p405_p0 = scmp.ne.s32.totalorder %s127_s23, %s404_s27 }
  0x13   : > { %p412_p7 = scmp.lt.s32.totalorder %s127_s23, %s127_s23  ;;  %p413_p6 = scmp.lt.s32.totalorder %s404_s27, %s404_s27 }
  0x14   : > { %p395_p13 = pneg %p615_p11 }
  0x15   : > { %p414_p9 = por %p413_p6, %p412_p7 }
  0x16   : > { %p407_p3 = pnand %p405_p0, %p395_p13 }
  0x18   : > { %p408_p5 = pneg %p407_p3 }
  0x1a   : > { %p415_p4 = pnand %p414_p9, %p408_p5 }
  0x1c   : > { %418 = shalt.err (!%p415_p4)
}
  0x1d   : > { %330 = dma.hbm_to_vmem [thread:$0]  (!%p615_p11), %s720_s1, 128, %s127_s23, [#allocation6]  }
  0x1e   : > { %s740_s25 = smov (%p33_p12, %s31_s25), 0  ;;  %p47_p6 = scmp.ne.s32.totalorder %s519_s11, %s515_s10 }
  0x1f   : > { %p48_p4 = scmp.eq.s32.totalorder %s531_s14, 0  ;;  %s35_s30 = ssub.s32 %s527_s13, %s740_s25 }
  0x20   : > { %p340_p9 = scmp.lt.s32.totalorder %s531_s14, 2  ;;  %p38_p10 = scmp.eq.s32.totalorder %s35_s30, 0 }
  0x21   : > { %p49_p13 = por %p48_p4, %p47_p6  ;;  %p638_p0 = por %p590_p2, %p47_p6 }
  0x22   : > { %s137_s4 = sand.u32 1, %s519_s11   ;;  %s310_s7 = sshll.u32 %s527_s13, 7 }
  0x23   : > { %s644_s5 = scalar_select %p38_p10, %s519_s11, %s40_s26  }
  0x24   : > { %s309_s6 = sshll.u32 %s137_s4, 3  ;;  %s147_s16 = scalar_lea.hbm %s719_s0, %s310_s7 }
  0x25   : > { %s141_s22 = scalar_lea.vmem [#allocation2], %s309_s6  ;;  %p650_p11 = pnand %p340_p9, %p49_p13 }
  0x26   : > { %s149_s23 = sshll.u32 %s141_s22, 4  ;;  %s138_s18 = scalar_lea.sflag [#allocation3], %s137_s4  ;;  %s150_s23 = int_to_ptr.vmem [resolvable:$true] %s149_s23 }
  0x27   : > { %p421_p2 = pneg %p650_p11  ;;  %s432_s27 = scalar_lea.vmem %s150_s23, 128 }
  0x28   : > { %p433_p12 = scmp.ne.s32.totalorder %s150_s23, %s432_s27  ;;  %s534_s26 = smov [#allocation2]  }
  0x29   : > { %s437_s28 = sshll.u32 %s534_s26, 4  ;;  %s438_s28 = int_to_ptr.vmem [resolvable:$false] %s437_s28 }
  0x2a   : > { %p435_p3 = pnand %p433_p12, %p421_p2  ;;  %s439_s29 = scalar_lea.vmem %s438_s28, 256 }
  0x2b   : > { %p440_p7 = scmp.lt.s32.totalorder %s150_s23, %s438_s28  ;;  %p441_p6 = scmp.lt.s32.totalorder %s439_s29, %s432_s27 }
  0x2c   : > { %p436_p5 = pneg %p435_p3 }
  0x2d   : > { %p442_p4 = por %p441_p6, %p440_p7 }
  0x2f   : > { %p443_p10 = pnand %p442_p4, %p436_p5 }
  0x31   : > { %446 = shalt.err (!%p443_p10)
}
  0x32   : > { %334 = dma.hbm_to_vmem [thread:$0]  (!%p650_p11), %s147_s16, 128, %s150_s23, %s138_s18  }
  0x33   : > { %158 = sbr.rel (%p606_p8) target bundleno = 189 (0xbd), region = 28  ;;  %s661_s30 = sand.u32 (!%p606_p8), 1, %s515_s10  }
  0x34   : > { %s312_s4 = sshll.u32 (!%p606_p8), %s661_s30, 3  ;;  %s161_s6 = scalar_lea.sflag (!%p606_p8), [#allocation3], %s661_s30 }
  0x35   : > { %s164_s7 = scalar_lea.vmem (!%p606_p8), [#allocation2], %s312_s4  ;;  %p731_p9 = scmp.ne.s32.totalorder (!%p606_p8), %s725_s19, 0 }
  0x38   : > { %498 = dma.done.wait (%p731_p9), %s161_s6, 128  }
  0x39   : > { %500 = vsyncadd (%p731_p9), %s161_s6, 4294967168 }
  0x3a   : > { %502 = dma.done.wait (%p586_p1), [#allocation6], 128  }
  0x3b   : > { %504 = vsyncadd (%p586_p1), [#allocation6], 4294967168  ;;  %v189_v0 = vld [vmem:[#allocation5] sm:$0xff]  ;;  %s535_s21 = smov 32   ;;  %s316_s8 = sshll.u32 %s523_s12, 7  ;;  %v190_v1 = vld [vmem:[%s164_s7] sm:$0xff] }
  0x3c   : > { %192 = vrot.lane.b32.xlu0 %v189_v0, %s535_s21  ;;  %s188_s15 = scalar_lea.vmem [#allocation7], %s312_s4  ;;  %vm195_vm0 = vcmask 261120   ;;  %vm197_vm1 = vcmask 588800   ;;  %s677_s23 = scalar_lea.hbm %s721_s2, %s316_s8 }
  0x3d   : > { %s214_s16 = sshll.u32 %s188_s15, 4  ;;  %s200_s17 = scalar_lea.sflag [#allocation4], %s661_s30  ;;  %s215_s16 = int_to_ptr.vmem [resolvable:$true] %s214_s16 }
  0x3e   : > { %s447_s24 = scalar_lea.vmem %s215_s16, 128  ;;  %s536_s12 = smov [#allocation7]  }
  0x3f   : > { %p448_p1 = scmp.ne.s32.totalorder %s215_s16, %s447_s24  ;;  %s451_s18 = sshll.u32 %s536_s12, 4  ;;  %s452_s18 = int_to_ptr.vmem [resolvable:$false] %s451_s18 }
  0x40   : > { %s453_s27 = scalar_lea.vmem %s452_s18, 256  ;;  %p454_p11 = scmp.lt.s32.totalorder %s215_s16, %s452_s18 }
  0x41   : > { %p449_p8 = pnand %p448_p1, %p638_p0  ;;  %p455_p2 = scmp.lt.s32.totalorder %s453_s27, %s447_s24 }
  0x43   : > { %p450_p13 = pneg %p449_p8  ;;  %p456_p12 = por %p455_p2, %p454_p11 }
  0x45   : > { %p457_p3 = pnand %p456_p12, %p450_p13 }
  0xae   : > { %v193_v2 = vpop.permute.xlu0 %192 }
  0xaf   : > { %v196_v3 = vsel %vm195_vm0, %v190_v1, %v193_v2 }
  0xb0   : > { %198 = vst.msk [vmem:[%s188_s15] sm:$0xff] %vm197_vm1, %v196_v3 }
  0xb1   : > { %460 = shalt.err (!%p457_p3)
}
  0xb2   : > { %s461_s26 = scalar_lea.hbm %s677_s23, 128  ;;  %s465_s30 = scalar_lea.hbm %s721_s2, 256 }
  0xb3   : > { %p462_p5 = scmp.ne.s32.totalorder %s677_s23, %s461_s26  ;;  %p466_p4 = scmp.lt.s32.totalorder %s677_s23, %s721_s2 }
  0xb4   : > { %p467_p10 = scmp.lt.s32.totalorder %s465_s30, %s461_s26 }
  0xb5   : > { %p463_p7 = pnand %p462_p5, %p638_p0 }
  0xb6   : > { %p468_p9 = por %p467_p10, %p466_p4 }
  0xb7   : > { %p464_p6 = pneg %p463_p7 }
  0xb9   : > { %p469_p1 = pnand %p468_p9, %p464_p6 }
  0xbb   : > { %472 = shalt.err (!%p469_p1)
}
  0xbc   : > { %325 = dma.vmem_to_hbm [thread:$0]  (%p638_p0), %s215_s16, 128, %s677_s23, %s200_s17  }
  0xbd PF: > { %s226_s7 = sand.u32 1, %s511_s9   ;;  %p732_p8 = scmp.ne.s32.totalorder %s726_s20, 0 }
  0xbe   : > { %p733_p13 = scmp.ge.s32.totalorder %s531_s14, 2  ;;  %s227_s21 = scalar_lea.sflag [#allocation4], %s226_s7 }
  0xc0   : > { %p336_p11 = pnand %p733_p13, %p732_p8 }
  0xc2   : > { %p337_p2 = pneg %p336_p11 }
  0xc4   : > { %506 = dma.done.wait (%p337_p2), %s227_s21, 128  }
  0xc5   : > { %508 = vsyncadd (%p337_p2), %s227_s21, 4294967168  ;;  %s19_s14 = sadd.s32 1, %s531_s14   ;;  %s734_s9 = smov %s515_s10 }
  0xc6   : > { %p16_p12 = scmp.ge.s32.totalorder %s19_s14, 4   ;;  %s735_s10 = smov %s519_s11 }
  0xc7   : > { %s736_s11 = smov %s644_s5  ;;  %s737_s12 = smov %s527_s13 }
  0xc8   : > { %s738_s13 = smov %s740_s25  ;;  %18 = sbr.rel (!%p16_p12) target bundleno = 7 (0x7), region = 77 }
  0xcd   :  { %232 = vsyncpa [#allocation3], 1 }
  0xce   :  { %234 = vsyncpa [#allocation3 + $0x1], 1 }
  0xcf   :  { %235 = vsyncpa [#allocation6], 1 }
  0xd0   :  { %236 = vsyncpa [#allocation4], 1 }
  0xd1   :  { %238 = vsyncpa [#allocation4 + $0x1], 1 }

</bundles_post_ra>
